<compile_context>
chip_gen: v7x
topology: tpu7x:2x2x1
jax: 0.10.0
libtpu: 0.0.40
codegen_flags: <defaults>
</compile_context>

<pallas_src>
import jax
import jax.numpy as jnp
from jax.experimental import pallas as pl
from jax.experimental.pallas import tpu as pltpu

IMAGENET_DEFAULT_MEAN = (0.485, 0.456, 0.406)
IMAGENET_DEFAULT_STD = (0.229, 0.224, 0.225)


def _fusenet_kernel(x_ref, w_ref, b_ref, out_ref):
    # x_ref:   [T_in, tile]     raw frames (channel c, one spatial slice on the lanes)
    # w_ref:   [1, M+1, T_in]   combined (output-rows x time) weights, pre-scaled by 1/std[c]
    # b_ref:   [1, M+1, 1]      per-row bias (only last row: -mean[c]/std[c])
    # out_ref: [1, M+1, tile]   rows: [apex-onset, num_frames diffs..., normalized apex]
    out_ref[0] = (
        jnp.dot(w_ref[0], x_ref[...], preferred_element_type=jnp.float32) + b_ref[0]
    ).astype(out_ref.dtype)


def _pick_tile(hw, t_in, m1, vmem_budget_bytes=8 * 1024 * 1024):
    """Largest multiple of 128 dividing hw whose double-buffered in+out blocks fit the budget."""
    # Per lane of tile: (T_in input rows + M+1 output rows) * 4 bytes * 2 (double-buffer).
    bytes_per_lane = 2 * (t_in + m1) * 4
    max_tile = max(128, vmem_budget_bytes // bytes_per_lane)
    best = None
    t = 128
    while t <= min(hw, max_tile):
        if hw % t == 0:
            best = t
        t += 128
    return best


def fusenet_transform(x, num_frames=8, tile=None):
    """x: [T_in, C, H, W] float32 in [0,1] (post ImglistToTensor + Resize).
    Returns [C, num_frames + 2, H, W] (same as the PyTorch module's output, frames_mode=0)."""
    T_in, C, H, W = x.shape
    assert T_in >= 2
    assert C == len(IMAGENET_DEFAULT_MEAN)
    M = num_frames + 1  # frames_mode in [0, 1] -> TimeInterpolation(num_frames + 1)
    HW = H * W
    CHW = C * HW
    if tile is None:
        tile = _pick_tile(HW, T_in, M + 1)
    assert tile is not None and tile % 128 == 0 and HW % tile == 0, (
        "H*W must have a multiple-of-128 divisor", HW, tile)
    n_j = HW // tile

    # Linear time-interpolation weight matrix [M, T_in].
    pos = jnp.linspace(0.0, float(T_in - 1), M)
    lo = jnp.clip(jnp.floor(pos).astype(jnp.int32), 0, T_in - 1)
    hi = jnp.clip(lo + 1, 0, T_in - 1)
    frac = (pos - lo.astype(jnp.float32)).astype(jnp.float32)
    w_interp = (jax.nn.one_hot(lo, T_in, dtype=jnp.float32) * (1.0 - frac)[:, None]
                + jax.nn.one_hot(hi, T_in, dtype=jnp.float32) * frac[:, None])  # [M, T_in]

    # Combined output-row weights [M+1, T_in]:
    #   row 0      : apex - onset      (mean cancels -> just 1/std scale)
    #   rows 1..M-1: consecutive interpolated-frame diffs (mean cancels)
    #   row M      : apex (mean handled via bias)
    e0 = jax.nn.one_hot(0, T_in, dtype=jnp.float32)
    e1 = jax.nn.one_hot(1, T_in, dtype=jnp.float32)
    w_out = jnp.concatenate(
        [(e1 - e0)[None, :], w_interp[1:] - w_interp[:-1], e1[None, :]], axis=0)

    mean = jnp.asarray(IMAGENET_DEFAULT_MEAN, jnp.float32)
    istd = 1.0 / jnp.asarray(IMAGENET_DEFAULT_STD, jnp.float32)
    w3 = (w_out[None, :, :] * istd[:, None, None]).astype(jnp.float32)   # [C, M+1, T_in]
    b3 = jnp.zeros((C, M + 1, 1), jnp.float32).at[:, M, 0].set(-mean * istd)

    # [T, C, H, W] -> [T, C*H*W] is a free reshape (row-major contiguous).
    x_flat = x.reshape(T_in, CHW).astype(jnp.float32)

    cost = pl.CostEstimate(
        flops=2 * C * (M + 1) * T_in * HW,
        transcendentals=0,
        bytes_accessed=(T_in * CHW + C * (M + 1) * HW) * 4 + w3.size * 4 + b3.size * 4,
    )

    out_flat = pl.pallas_call(
        _fusenet_kernel,
        out_shape=jax.ShapeDtypeStruct((C, M + 1, HW), jnp.float32),
        grid_spec=pltpu.PrefetchScalarGridSpec(
            num_scalar_prefetch=0,
            grid=(C, n_j),
            in_specs=[
                # x rows: frame t, lanes = channel c's j-th spatial slice
                pl.BlockSpec((T_in, tile), lambda c, j: (0, c * n_j + j)),
                pl.BlockSpec((1, M + 1, T_in), lambda c, j: (c, 0, 0)),   # per-channel weights
                pl.BlockSpec((1, M + 1, 1), lambda c, j: (c, 0, 0)),      # per-channel bias
            ],
            out_specs=pl.BlockSpec((1, M + 1, tile), lambda c, j: (c, 0, j)),
        ),
        compiler_params=pltpu.CompilerParams(
            dimension_semantics=("parallel", "parallel")),
        cost_estimate=cost,
    )(x_flat, w3, b3)

    # Output is already CBHW-ordered: [C, M+1, H*W] -> [C, M+1, H, W] is a free reshape.
    return out_flat.reshape(C, M + 1, H, W)


def fusenet_reference(x, num_frames=8):
    """Pure-JAX reference mirroring the PyTorch forward (frames_mode=0, val path)."""
    T_in, C, H, W = x.shape
    M = num_frames + 1
    mean = jnp.asarray(IMAGENET_DEFAULT_MEAN, jnp.float32)[None, :, None, None]
    std = jnp.asarray(IMAGENET_DEFAULT_STD, jnp.float32)[None, :, None, None]
    norm = lambda t: (t - mean) / std

    onset_apex = norm(x[:2]).transpose(1, 0, 2, 3)  # [C, 2, H, W]

    pos = jnp.linspace(0.0, float(T_in - 1), M)
    lo = jnp.clip(jnp.floor(pos).astype(jnp.int32), 0, T_in - 1)
    hi = jnp.clip(lo + 1, 0, T_in - 1)
    frac = (pos - lo.astype(jnp.float32))[:, None, None, None]
    frames = x[lo] * (1.0 - frac) + x[hi] * frac
    frames = norm(frames).transpose(1, 0, 2, 3)     # [C, M, H, W]

    apex_sub_onset = onset_apex[:, -1] - onset_apex[:, 0]
    framesdiff = frames[:, 1:] - frames[:, :-1]
    return jnp.concatenate(
        [apex_sub_onset[:, None], framesdiff, onset_apex[:, 1][:, None]], axis=1)


if __name__ == "__main__":
    key = jax.random.PRNGKey(0)
    T_in, C, H, W = 5, 3, 16, 16          # 5 raw frames of a 16x16 RGB clip
    # Simulates ImglistToTensor()+Resize output: float32 in [0,1], shape [T, C, H, W].
    x = jax.random.uniform(key, (T_in, C, H, W), dtype=jnp.float32)

    ok = True
    for num_frames in (8, 16):
        out = fusenet_transform(x, num_frames=num_frames)
        out = jax.block_until_ready(out)
        ref = fusenet_reference(x, num_frames=num_frames)
        assert out.shape == (C, num_frames + 2, H, W), out.shape
        max_err = float(jnp.max(jnp.abs(out - ref)))
        if not jnp.allclose(out, ref, atol=2e-3, rtol=2e-3):
            ok = False
            print("MISMATCH num_frames=%d max_err=%g" % (num_frames, max_err))
    if ok:
        print("KERNEL_OK")
</pallas_src>

<mosaic_0001>
module attributes {stable_mosaic.version = 11 : i64} {
  func.func @_fusenet_kernel(%arg0: i32, %arg1: i32, %arg2: memref<5x256xf32, #tpu.memory_space<vmem>>, %arg3: memref<1x10x5xf32, #tpu.memory_space<vmem>>, %arg4: memref<1x10x1xf32, #tpu.memory_space<vmem>>, %arg5: memref<1x10x256xf32, #tpu.memory_space<vmem>>) attributes {dimension_semantics = [#tpu.dimension_semantics<parallel>, #tpu.dimension_semantics<parallel>], iteration_bounds = array<i64: 3, 1>, scalar_prefetch = 0 : i64, scratch_operands = 0 : i64, tpu.core_type = #tpu.core_type<tc>, window_params = [{transform_indices = @transform_0, window_bounds = array<i64: 5, 256>}, {transform_indices = @transform_1, window_bounds = array<i64: 1, 10, 5>}, {transform_indices = @transform_2, window_bounds = array<i64: 1, 10, 1>}, {transform_indices = @transform_3, window_bounds = array<i64: 1, 10, 256>}]} {
    %c0 = arith.constant 0 : index
    %c0_0 = arith.constant 0 : index
    %c0_1 = arith.constant 0 : index
    %0 = vector.load %arg3[%c0, %c0_0, %c0_1] : memref<1x10x5xf32, #tpu.memory_space<vmem>>, vector<1x10x5xf32>
    %1 = vector.shape_cast %0 : vector<1x10x5xf32> to vector<10x5xf32>
    %c0_2 = arith.constant 0 : index
    %c0_3 = arith.constant 0 : index
    %2 = vector.load %arg2[%c0_2, %c0_3] : memref<5x256xf32, #tpu.memory_space<vmem>>, vector<5x256xf32>
    %cst = arith.constant dense<0.000000e+00> : vector<10x256xf32>
    %3 = tpu.matmul %1, %2, %cst {dimension_numbers = #tpu.dot_dimension_numbers<[1], [0], [0], [1], [0, 0, 1, 1], [], []>} : vector<10x5xf32>, vector<5x256xf32>, vector<10x256xf32> -> vector<10x256xf32>
    %c0_4 = arith.constant 0 : index
    %c0_5 = arith.constant 0 : index
    %c0_6 = arith.constant 0 : index
    %4 = vector.load %arg4[%c0_4, %c0_5, %c0_6] : memref<1x10x1xf32, #tpu.memory_space<vmem>>, vector<1x10x1xf32>
    %5 = vector.shape_cast %4 : vector<1x10x1xf32> to vector<10x1xf32>
    %6 = vector.broadcast %5 : vector<10x1xf32> to vector<10x256xf32>
    %7 = arith.addf %3, %6 : vector<10x256xf32>
    %c0_7 = arith.constant 0 : index
    %c0_8 = arith.constant 0 : index
    %c0_9 = arith.constant 0 : index
    %8 = vector.load %arg5[%c0_7, %c0_8, %c0_9] : memref<1x10x256xf32, #tpu.memory_space<vmem>>, vector<1x10x256xf32>
    %9 = vector.shape_cast %8 : vector<1x10x256xf32> to vector<10x256xf32>
    %10 = vector.shape_cast %7 : vector<10x256xf32> to vector<1x10x256xf32>
    tpu.vector_store %arg5[%c0_7, %c0_8, %c0_9], %10 {strides = array<i32>} : memref<1x10x256xf32, #tpu.memory_space<vmem>>, vector<1x10x256xf32>,
    return
  }
  func.func @transform_0(%arg0: i32, %arg1: i32) -> (i32, i32) {
    %c1_i32 = arith.constant 1 : i32
    %0 = arith.muli %arg0, %c1_i32 : i32
    %1 = arith.addi %0, %arg1 : i32
    %c0_i32 = arith.constant 0 : i32
    %c0_i32_0 = arith.constant 0 : i32
    return %c0_i32, %1 : i32, i32
  }
  func.func @transform_1(%arg0: i32, %arg1: i32) -> (i32, i32, i32) {
    %c0_i32 = arith.constant 0 : i32
    %c0_i32_0 = arith.constant 0 : i32
    %c0_i32_1 = arith.constant 0 : i32
    return %arg0, %c0_i32, %c0_i32_0 : i32, i32, i32
  }
  func.func @transform_2(%arg0: i32, %arg1: i32) -> (i32, i32, i32) {
    %c0_i32 = arith.constant 0 : i32
    %c0_i32_0 = arith.constant 0 : i32
    %c0_i32_1 = arith.constant 0 : i32
    return %arg0, %c0_i32, %c0_i32_0 : i32, i32, i32
  }
  func.func @transform_3(%arg0: i32, %arg1: i32) -> (i32, i32, i32) {
    %c0_i32 = arith.constant 0 : i32
    %c0_i32_0 = arith.constant 0 : i32
    return %arg0, %c0_i32, %arg1 : i32, i32, i32
  }
}

</mosaic_0001>

<bundles_post_ra>
// kernel: tpu_custom_call.1
= control target key start
LH: loop header
LB: loop body
LE: loop exit
PB: predicated region body
PF: predicated region fallthrough
CT: control target
= control target key end

     0   :  { %s556_s12 = smov 0   ;;  %s558_s13 = smov 0   ;;  %s599_s0 = inlined_call_operand.vmem [shape: f32[5,768], index: 0, kind: input, shape index: {}]   ;;  %s600_s1 = inlined_call_operand.vmem [shape: f32[3,10,5], index: 1, kind: input, shape index: {}]   ;;  %s601_s2 = inlined_call_operand.vmem [shape: f32[3,10,1], index: 2, kind: input, shape index: {}]   ;;  %s602_s3 = inlined_call_operand.vmem [shape: f32[3,10,256], index: 3, kind: output, shape index: {}]  }
   0x1   :  { %s560_s14 = smov 0  }
   0x2 LB: > { %s25_s15 = sadd.s32 1, %s528_s13  ;;  %p463_p0 = scmp.ge.s32.totalorder %s532_s14, 1  ;;  %s532_s14 = sphi %s560_s14, %s13_s14   ;;  %s528_s13 = sphi %s558_s13, %s604_s13   ;;  %s524_s12 = sphi %s556_s12, %s603_s12  }
   0x3   : > { %p27_p1 = scmp.ge.s32.totalorder %s25_s15, 3  ;;  %p176_p2 = scmp.lt.s32.totalorder %s532_s14, 4 }
   0x5   : > { %s606_s15 = smov (%p27_p1, %s25_s15), 0  ;;  %p177_p3 = pnand %p463_p0, %p176_p2 }
   0x6   : > { %s464_s16 = sshll.u32 (!%p177_p3), %s524_s12, 1  ;;  %p223_p4 = scmp.lt.s32.totalorder (!%p177_p3), %s524_s12, 2  ;;  %v534_v0 = vmov (!%p177_p3), 0.0   ;;  %v535_v1 = vmov (!%p177_p3), 0   ;;  %vm266_vm0 = vcmask (!%p177_p3), 1044480   ;;  %vm259_vm1 = vcmask (!%p177_p3), 39936  }
   0x7   : > { %180 = sbr.rel (%p177_p3) target bundleno = 236 (0xec), region = 32  ;;  %p217_p5 = scmp.lt.s32.totalorder (!%p177_p3), %s464_s16, 5  ;;  %337 = vmatprep.mubr.f32.mxu0 (!%p177_p3), %v534_v0  ;;  %343 = vmatprep.mubr.f32.mxu1 (!%p177_p3), %v534_v0 }
   0x8   : > { %509 = vset.pattern.permute.xlu0 (!%p177_p3), %v535_v1 }
   0xe   : > { %s608_s12 = smov (!%p223_p4, %s524_s12), 2  ;;  %s610_s16 = smov (!%p217_p5, %s464_s16), 5 }
   0xf   : > { %s478_s17 = sshll.u32 %s608_s12, 4  ;;  %s465_s18 = sshll.u32 %s610_s16, 3 }
  0x10   : > { %s227_s21 = scalar_lea.vmem %s600_s1, %s478_s17  ;;  %s220_s24 = scalar_lea.vmem %s599_s0, %s465_s18 }
  0x11   : > { %v243_v2 = vld [vmem:[%s227_s21] sm:$0xff]  ;;  %s232_s27 = scalar_lea.vmem %s601_s2, %s478_s17  ;;  %v246_v3 = vld [vmem:[%s220_s24 + $0x8] sm:$0x1f]  ;;  %s480_s28 = sshll.u32 %s608_s12, 5 }
  0x12   : > { %v245_v4 = vld [vmem:[%s220_s24] sm:$0x1f]  ;;  %v244_v5 = vld [vmem:[%s227_s21 + $0x8] sm:$0x3]  ;;  %472 = vmatprep.subr.msk.mxu0 %vm266_vm0, %v246_v3  ;;  %481 = vmatprep.subr.msk.mxu1 %vm266_vm0, %v246_v3  ;;  %s241_s4 = scalar_lea.vmem %s602_s3, %s480_s28 }
  0x13   : > { %v247_v6 = vld [vmem:[%s232_s27] sm:$0xff]  ;;  %473 = vmatpush1.msk.msra.mxu0 %vm266_vm0, %v245_v4  ;;  %482 = vmatpush1.msk.msra.mxu1 %vm266_vm0, %v245_v4  ;;  %v248_v7 = vld [vmem:[%s232_s27 + $0x8] sm:$0x3] }
  0x14   : > { %474 = vmatmul.mubr.msk.f32.vlgmr.msra.gmra.mrb[0].mxu0 %vm259_vm1, %v243_v2  ;;  %475 = vmatmul.mubr.msk.f32.vlgmr.msra.gmra.mrb[0].mxu1 %vm259_vm1, %v244_v5 }
  0x15   : > { %251 = vperm.xlu0 %509, %v247_v6  }
  0x19   : > { %256 = vperm.xlu0 %509, %v248_v7  }
  0x94   : > { %v252_v8 = vpop.permute.xlu0 %251 }
  0x98   : > { %v257_v9 = vpop.permute.xlu0 %256 }
  0xe7   : > { %v339_v10 = vpop.f32.mrb[0].mxu0  ;;  %v345_v11 = vpop.f32.mrb[0].mxu1 }
  0xe8   : > { %v340_v12 = vadd.f32 %v339_v10, %v252_v8  ;;  %v346_v13 = vadd.f32 %v345_v11, %v257_v9  ;;  %v341_v14 = vpop.f32.mrb[1].mxu0  ;;  %v347_v15 = vpop.f32.mrb[1].mxu1 }
  0xe9   : > { %v342_v16 = vadd.f32 %v341_v14, %v252_v8  ;;  %v348_v17 = vadd.f32 %v347_v15, %v257_v9 }
  0xea   : > { %350 = vst [vmem:[%s241_s4] sm:$0xff] %v340_v12  ;;  %352 = vst [vmem:[%s241_s4 + $0x10] sm:$0x3] %v346_v13 }
  0xeb   : > { %351 = vst [vmem:[%s241_s4 + $0x8] sm:$0xff] %v342_v16  ;;  %353 = vst [vmem:[%s241_s4 + $0x18] sm:$0x3] %v348_v17 }
  0xec PF: > { %s13_s14 = sadd.s32 1, %s532_s14   ;;  %s603_s12 = smov %s528_s13 }
  0xed   : > { %p10_p6 = scmp.ge.s32.totalorder %s13_s14, 5   ;;  %s604_s13 = smov %s606_s15 }
  0xef   :  { %12 = sbr.rel (!%p10_p6) target bundleno = 2 (0x2), region = 68 }

</bundles_post_ra>
